<compile_context>
chip_gen: v5e
topology: v5e:2x2
jax: 0.10.0
libtpu: 0.0.40
codegen_flags: <defaults>
</compile_context>

<pallas_src>
import functools
from typing import NamedTuple, Optional, Tuple

import jax
import jax.numpy as jnp
from jax.experimental import pallas as pl
from jax.experimental.pallas import tpu as pltpu


def _round_up(x: int, k: int) -> int:
    return ((x + k - 1) // k) * k


def _cdiv(a: int, b: int) -> int:
    return (a + b - 1) // b


def _sublane(dtype) -> int:
    # Sublane packing: f32 -> 8 rows/vreg, bf16 -> 16, int8/fp8 -> 32.
    return 8 * max(1, 4 // jnp.dtype(dtype).itemsize)


def _tpu_vmem_and_cores() -> Tuple[int, int]:
    """(per-core VMEM bytes, tensorcores per chip) with a safe fallback."""
    try:
        vmem = int(pltpu.get_tpu_info().vmem_capacity_bytes)
    except Exception:
        vmem = 64 * 2**20  # conservative lower bound (v7x per-TC VMEM)
    # Heuristic: v7x = 64 MiB/TC with 2 TCs; v5e/v6e = 128 MiB with 1 TC.
    cores = 2 if vmem <= 96 * 2**20 else 1
    return vmem, cores


class PreparedMLP(NamedTuple):
    weights: Tuple[jax.Array, ...]   # padded (K_pad, N_pad); layer 0 keeps K = d_in
    biases: Tuple[jax.Array, ...]    # padded (1, N_pad)
    d_in: int
    d_out: int


def prepare_mlp_params(params, compute_dtype: Optional[jnp.dtype] = None) -> PreparedMLP:
    """Pad (and optionally cast, e.g. to bf16) weights/biases ONCE, outside the
    per-call path.  params: list of (W, b) with W stored (in_dim, out_dim),
    i.e. y = x @ W + b (PyTorch W_torch = W.T)."""
    ws, bs = [], []
    d_in = params[0][0].shape[0]
    d_out = params[-1][0].shape[1]
    for l, (w, b) in enumerate(params):
        kin, kout = w.shape
        # Layer 0 keeps its natural K so x never needs feature-dim padding
        # (full-extent block dims satisfy the (8,128) rule); later layers' K
        # must match the previous layer's padded N.
        k_pad = kin if l == 0 else _round_up(kin, 128)
        n_pad = _round_up(kout, 128)
        wp = jnp.pad(w, ((0, k_pad - kin), (0, n_pad - kout)))
        bp = jnp.pad(b.reshape(1, -1), ((0, 0), (0, n_pad - kout)))
        if compute_dtype is not None:
            wp = wp.astype(compute_dtype)
            bp = bp.astype(compute_dtype)
        ws.append(wp)
        bs.append(bp)
    return PreparedMLP(tuple(ws), tuple(bs), d_in, d_out)


def _fused_mlp_kernel(*refs, num_layers):
    # refs = (x_ref, w0, b0, w1, b1, ..., w_{L-1}, b_{L-1}, o_ref)
    x_ref, o_ref = refs[0], refs[-1]
    h = x_ref[...]
    for l in range(num_layers):
        w = refs[1 + 2 * l][...]
        b = refs[2 + 2 * l][...].astype(jnp.float32)
        h = jnp.dot(h.astype(w.dtype), w, preferred_element_type=jnp.float32) + b
        if l < num_layers - 1:
            h = jnp.maximum(h, 0.0)      # fused ReLU on all but the last layer
    o_ref[...] = h.astype(o_ref.dtype)


def _choose_row_tile(m: int, tm: int, sublane: int, min_tiles: int):
    """Rebalanced row tile: waste <= one sublane group; >= min_tiles tiles."""
    m_sub = _round_up(m, sublane)
    tm = _round_up(max(tm, sublane), sublane)
    n_tiles = max(_cdiv(m_sub, tm), min_tiles)
    n_tiles = max(1, min(n_tiles, m_sub // sublane))
    tm_eff = _round_up(_cdiv(m_sub, n_tiles), sublane)
    grid_m = _cdiv(m_sub, tm_eff)
    m_pad = tm_eff * grid_m
    return tm_eff, m_pad, grid_m


def mlp_forward(x, params, *, tm: int = 512,
                compute_dtype: Optional[jnp.dtype] = None,
                x_buffers: int = 2):
    """x: (..., input_dim) -> (..., output_dim).

    `params` is either a raw list of (W, b) (W stored (in_dim, out_dim)) or a
    PreparedMLP from prepare_mlp_params (preferred: pads/casts only once)."""
    prepared = params if isinstance(params, PreparedMLP) else prepare_mlp_params(
        params, compute_dtype=compute_dtype)
    num_layers = len(prepared.weights)
    lead_shape = x.shape[:-1]
    d_in, d_out = prepared.d_in, prepared.d_out
    assert x.shape[-1] == d_in, "input feature dim mismatch"

    xf = x.reshape(-1, d_in)
    m = xf.shape[0]

    vmem_cap, num_cores = _tpu_vmem_and_cores()
    sublane = _sublane(prepared.weights[0].dtype)

    # Row tiling: large tiles amortize per-grid-step overhead; split so both
    # TensorCores are busy on dual-core chips; rebalance ragged m.
    tm_eff, m_pad, grid_m = _choose_row_tile(m, tm, sublane, min_tiles=num_cores)

    # Only rows are padded; the feature dim keeps its natural extent so no
    # extra HBM pass is made over the activation stream.
    x_pad = xf if m_pad == m else jnp.pad(xf, ((0, m_pad - m), (0, 0)))

    n_pads = [w.shape[1] for w in prepared.weights]

    x_spec_kwargs = {}
    if x_buffers is not None and x_buffers != 2:
        x_spec_kwargs["pipeline_mode"] = pl.Buffered(int(x_buffers))
    flat_inputs = [x_pad]
    in_specs = [pl.BlockSpec((tm_eff, d_in), lambda i: (i, 0), **x_spec_kwargs)]
    for l in range(num_layers):
        w, b = prepared.weights[l], prepared.biases[l]
        flat_inputs += [w, b]
        # Constant index_map + single buffering: fetched once, resident in
        # VMEM at 1x footprint across all row tiles.
        in_specs += [
            pl.BlockSpec(w.shape, lambda i: (0, 0), pipeline_mode=pl.Buffered(1)),
            pl.BlockSpec(b.shape, lambda i: (0, 0), pipeline_mode=pl.Buffered(1)),
        ]
    out_spec = pl.BlockSpec((tm_eff, n_pads[-1]), lambda i: (i, 0))

    # --- cost estimate (padded work actually performed) ----------------------
    flops = 2 * m_pad * sum(w.shape[0] * w.shape[1] for w in prepared.weights)
    weight_bytes = (
        sum(w.size * jnp.dtype(w.dtype).itemsize for w in prepared.weights)
        + sum(b.size * jnp.dtype(b.dtype).itemsize for b in prepared.biases)
    )
    bytes_accessed = (
        m_pad * d_in * x.dtype.itemsize
        + weight_bytes
        + m_pad * n_pads[-1] * x.dtype.itemsize
    )
    cost = pl.CostEstimate(flops=int(flops), transcendentals=0,
                           bytes_accessed=int(bytes_accessed))

    # --- VMEM budget, clamped to the chip's physical capacity ----------------
    xb = max(2, int(x_buffers) if x_buffers else 2)
    io_bytes = (xb * tm_eff * d_in + 2 * tm_eff * n_pads[-1]) * x.dtype.itemsize
    act_bytes = 2 * tm_eff * max(n_pads) * 4          # f32 intermediates
    vmem_needed = weight_bytes + io_bytes + act_bytes
    vmem_limit = int(min(0.85 * vmem_cap, max(32 * 2**20, 1.5 * vmem_needed)))

    kernel = functools.partial(_fused_mlp_kernel, num_layers=num_layers)
    out_pad = pl.pallas_call(
        kernel,
        out_shape=jax.ShapeDtypeStruct((m_pad, n_pads[-1]), x.dtype),
        grid_spec=pltpu.PrefetchScalarGridSpec(
            num_scalar_prefetch=0,
            grid=(grid_m,),
            in_specs=in_specs,
            out_specs=out_spec,
        ),
        compiler_params=pltpu.CompilerParams(
            dimension_semantics=("parallel",),   # row tiles shard across TCs
            vmem_limit_bytes=vmem_limit,
        ),
        cost_estimate=cost,
    )(*flat_inputs)

    out = out_pad[:m, :d_out]
    return out.reshape(*lead_shape, d_out)


def init_mlp_params(key, input_dim, hidden_dim, output_dim, num_layers,
                    dtype=jnp.float32):
    """Deterministic init matching nn.Linear shapes (Kaiming-uniform-like)."""
    h = [hidden_dim] * (num_layers - 1)
    dims_in = [input_dim] + h
    dims_out = h + [output_dim]
    params = []
    for n, k in zip(dims_in, dims_out):
        key, kw, kb = jax.random.split(key, 3)
        bound = 1.0 / jnp.sqrt(jnp.asarray(n, dtype=jnp.float32))
        w = jax.random.uniform(kw, (n, k), dtype=dtype, minval=-bound, maxval=bound)
        b = jax.random.uniform(kb, (k,), dtype=dtype, minval=-bound, maxval=bound)
        params.append((w, b))
    return params


def mlp_reference(x, params):
    num_layers = len(params)
    for i, (w, b) in enumerate(params):
        x = x @ w + b
        if i < num_layers - 1:
            x = jnp.maximum(x, 0.0)
    return x


if __name__ == "__main__":
    key = jax.random.PRNGKey(0)
    kx, kp = jax.random.split(key)

    batch, seq = 2, 8
    input_dim, hidden_dim, output_dim, num_layers = 32, 64, 16, 3

    x = jax.random.normal(kx, (batch, seq, input_dim), dtype=jnp.float32)
    params = init_mlp_params(kp, input_dim, hidden_dim, output_dim, num_layers)
    ref = mlp_reference(x, params)

    # Hoisted padding (done once), f32 compute path.
    prepped = prepare_mlp_params(params)
    out = jax.block_until_ready(mlp_forward(x, prepped))
    assert out.shape == (batch, seq, output_dim)
    assert jnp.allclose(out, ref, atol=1e-4, rtol=1e-4), "mismatch vs reference"

    # Ragged row count (exercises rebalanced row tiling + row padding path).
    x2 = jax.random.normal(kx, (3, 7, input_dim), dtype=jnp.float32)
    out2 = jax.block_until_ready(mlp_forward(x2, prepped))
    ref2 = mlp_reference(x2, params)
    assert out2.shape == (3, 7, output_dim)
    assert jnp.allclose(out2, ref2, atol=1e-4, rtol=1e-4), "mismatch (ragged rows)"

    # MXU-native bf16 matmul path (f32 accumulation); looser tolerance since
    # operands are rounded to bf16.
    prepped_bf16 = prepare_mlp_params(params, compute_dtype=jnp.bfloat16)
    out3 = jax.block_until_ready(mlp_forward(x, prepped_bf16))
    assert out3.shape == (batch, seq, output_dim)
    assert jnp.allclose(out3.astype(jnp.float32), ref, atol=5e-2, rtol=5e-2), \
        "mismatch (bf16 compute)"

    print("KERNEL_OK")
</pallas_src>

<mosaic_0001>
module attributes {stable_mosaic.version = 11 : i64} {
  func.func @_fused_mlp_kernel(%arg0: i32, %arg1: memref<8x32xf32, #tpu.memory_space<vmem>>, %arg2: memref<32x128xf32, #tpu.memory_space<vmem>>, %arg3: memref<1x128xf32, #tpu.memory_space<vmem>>, %arg4: memref<128x128xf32, #tpu.memory_space<vmem>>, %arg5: memref<1x128xf32, #tpu.memory_space<vmem>>, %arg6: memref<128x128xf32, #tpu.memory_space<vmem>>, %arg7: memref<1x128xf32, #tpu.memory_space<vmem>>, %arg8: memref<8x128xf32, #tpu.memory_space<vmem>>) attributes {dimension_semantics = [#tpu.dimension_semantics<parallel>], iteration_bounds = array<i64: 2>, scalar_prefetch = 0 : i64, scratch_operands = 0 : i64, tpu.core_type = #tpu.core_type<tc>, window_params = [{transform_indices = @transform_0, window_bounds = array<i64: 8, 32>}, {pipeline_mode = #tpu.pipeline_mode<synchronous>, transform_indices = @transform_1, window_bounds = array<i64: 32, 128>}, {pipeline_mode = #tpu.pipeline_mode<synchronous>, transform_indices = @transform_2, window_bounds = array<i64: 1, 128>}, {pipeline_mode = #tpu.pipeline_mode<synchronous>, transform_indices = @transform_3, window_bounds = array<i64: 128, 128>}, {pipeline_mode = #tpu.pipeline_mode<synchronous>, transform_indices = @transform_4, window_bounds = array<i64: 1, 128>}, {pipeline_mode = #tpu.pipeline_mode<synchronous>, transform_indices = @transform_5, window_bounds = array<i64: 128, 128>}, {pipeline_mode = #tpu.pipeline_mode<synchronous>, transform_indices = @transform_6, window_bounds = array<i64: 1, 128>}, {transform_indices = @transform_7, window_bounds = array<i64: 8, 128>}]} {
    %c0 = arith.constant 0 : index
    %c0_0 = arith.constant 0 : index
    %0 = vector.load %arg1[%c0, %c0_0] : memref<8x32xf32, #tpu.memory_space<vmem>>, vector<8x32xf32>
    %c0_1 = arith.constant 0 : index
    %c0_2 = arith.constant 0 : index
    %1 = vector.load %arg2[%c0_1, %c0_2] : memref<32x128xf32, #tpu.memory_space<vmem>>, vector<32x128xf32>
    %c0_3 = arith.constant 0 : index
    %c0_4 = arith.constant 0 : index
    %2 = vector.load %arg3[%c0_3, %c0_4] : memref<1x128xf32, #tpu.memory_space<vmem>>, vector<1x128xf32>
    %cst = arith.constant dense<0.000000e+00> : vector<8x128xf32>
    %3 = tpu.matmul %0, %1, %cst {dimension_numbers = #tpu.dot_dimension_numbers<[1], [0], [0], [1], [0, 0, 1, 1], [], []>} : vector<8x32xf32>, vector<32x128xf32>, vector<8x128xf32> -> vector<8x128xf32>
    %4 = vector.broadcast %2 : vector<1x128xf32> to vector<8x128xf32>
    %5 = arith.addf %3, %4 : vector<8x128xf32>
    %cst_5 = arith.constant 0.000000e+00 : f32
    %6 = vector.broadcast %cst_5 : f32 to vector<8x128xf32>
    %7 = arith.maximumf %5, %6 : vector<8x128xf32>
    %c0_6 = arith.constant 0 : index
    %c0_7 = arith.constant 0 : index
    %8 = vector.load %arg4[%c0_6, %c0_7] : memref<128x128xf32, #tpu.memory_space<vmem>>, vector<128x128xf32>
    %c0_8 = arith.constant 0 : index
    %c0_9 = arith.constant 0 : index
    %9 = vector.load %arg5[%c0_8, %c0_9] : memref<1x128xf32, #tpu.memory_space<vmem>>, vector<1x128xf32>
    %cst_10 = arith.constant dense<0.000000e+00> : vector<8x128xf32>
    %10 = tpu.matmul %7, %8, %cst_10 {dimension_numbers = #tpu.dot_dimension_numbers<[1], [0], [0], [1], [0, 0, 1, 1], [], []>} : vector<8x128xf32>, vector<128x128xf32>, vector<8x128xf32> -> vector<8x128xf32>
    %11 = vector.broadcast %9 : vector<1x128xf32> to vector<8x128xf32>
    %12 = arith.addf %10, %11 : vector<8x128xf32>
    %cst_11 = arith.constant 0.000000e+00 : f32
    %13 = vector.broadcast %cst_11 : f32 to vector<8x128xf32>
    %14 = arith.maximumf %12, %13 : vector<8x128xf32>
    %c0_12 = arith.constant 0 : index
    %c0_13 = arith.constant 0 : index
    %15 = vector.load %arg6[%c0_12, %c0_13] : memref<128x128xf32, #tpu.memory_space<vmem>>, vector<128x128xf32>
    %c0_14 = arith.constant 0 : index
    %c0_15 = arith.constant 0 : index
    %16 = vector.load %arg7[%c0_14, %c0_15] : memref<1x128xf32, #tpu.memory_space<vmem>>, vector<1x128xf32>
    %cst_16 = arith.constant dense<0.000000e+00> : vector<8x128xf32>
    %17 = tpu.matmul %14, %15, %cst_16 {dimension_numbers = #tpu.dot_dimension_numbers<[1], [0], [0], [1], [0, 0, 1, 1], [], []>} : vector<8x128xf32>, vector<128x128xf32>, vector<8x128xf32> -> vector<8x128xf32>
    %18 = vector.broadcast %16 : vector<1x128xf32> to vector<8x128xf32>
    %19 = arith.addf %17, %18 : vector<8x128xf32>
    %c0_17 = arith.constant 0 : index
    %c0_18 = arith.constant 0 : index
    %20 = vector.load %arg8[%c0_17, %c0_18] : memref<8x128xf32, #tpu.memory_space<vmem>>, vector<8x128xf32>
    tpu.vector_store %arg8[%c0_17, %c0_18], %19 {strides = array<i32>} : memref<8x128xf32, #tpu.memory_space<vmem>>, vector<8x128xf32>,
    return
  }
  func.func @transform_0(%arg0: i32) -> (i32, i32) {
    %c0_i32 = arith.constant 0 : i32
    %c0_i32_0 = arith.constant 0 : i32
    return %arg0, %c0_i32 : i32, i32
  }
  func.func @transform_1(%arg0: i32) -> (i32, i32) {
    %c0_i32 = arith.constant 0 : i32
    %c0_i32_0 = arith.constant 0 : i32
    %c0_i32_1 = arith.constant 0 : i32
    return %c0_i32, %c0_i32_0 : i32, i32
  }
  func.func @transform_2(%arg0: i32) -> (i32, i32) {
    %c0_i32 = arith.constant 0 : i32
    %c0_i32_0 = arith.constant 0 : i32
    %c0_i32_1 = arith.constant 0 : i32
    return %c0_i32, %c0_i32_0 : i32, i32
  }
  func.func @transform_3(%arg0: i32) -> (i32, i32) {
    %c0_i32 = arith.constant 0 : i32
    %c0_i32_0 = arith.constant 0 : i32
    %c0_i32_1 = arith.constant 0 : i32
    return %c0_i32, %c0_i32_0 : i32, i32
  }
  func.func @transform_4(%arg0: i32) -> (i32, i32) {
    %c0_i32 = arith.constant 0 : i32
    %c0_i32_0 = arith.constant 0 : i32
    %c0_i32_1 = arith.constant 0 : i32
    return %c0_i32, %c0_i32_0 : i32, i32
  }
  func.func @transform_5(%arg0: i32) -> (i32, i32) {
    %c0_i32 = arith.constant 0 : i32
    %c0_i32_0 = arith.constant 0 : i32
    %c0_i32_1 = arith.constant 0 : i32
    return %c0_i32, %c0_i32_0 : i32, i32
  }
  func.func @transform_6(%arg0: i32) -> (i32, i32) {
    %c0_i32 = arith.constant 0 : i32
    %c0_i32_0 = arith.constant 0 : i32
    %c0_i32_1 = arith.constant 0 : i32
    return %c0_i32, %c0_i32_0 : i32, i32
  }
  func.func @transform_7(%arg0: i32) -> (i32, i32) {
    %c0_i32 = arith.constant 0 : i32
    %c0_i32_0 = arith.constant 0 : i32
    return %arg0, %c0_i32 : i32, i32
  }
}

</mosaic_0001>

<bundles_post_ra>
// kernel: tpu_custom_call.1
= control target key start
LH: loop header
LB: loop body
LE: loop exit
PB: predicated region body
PF: predicated region fallthrough
CT: control target
= control target key end

     0   :  { %s1088_s0 = inlined_call_operand.hbm [shape: f32[16,32], index: 0, kind: input, shape index: {}]   ;;  %s1089_s1 = inlined_call_operand.hbm [shape: f32[32,128], index: 1, kind: input, shape index: {}]   ;;  %s1090_s2 = inlined_call_operand.vmem [shape: f32[1,128], index: 2, kind: input, shape index: {}]   ;;  %s1091_s3 = inlined_call_operand.hbm [shape: f32[128,128], index: 3, kind: input, shape index: {}]   ;;  %s1092_s4 = inlined_call_operand.vmem [shape: f32[1,128], index: 4, kind: input, shape index: {}]   ;;  %s1093_s5 = inlined_call_operand.hbm [shape: f32[128,128], index: 5, kind: input, shape index: {}]   ;;  %s1094_s6 = inlined_call_operand.vmem [shape: f32[1,128], index: 6, kind: input, shape index: {}]   ;;  %s1095_s7 = inlined_call_operand.hbm [shape: f32[16,128], index: 7, kind: output, shape index: {}]  }
   0x1   :  { %1096 = sst [smem:[#allocation15_spill]] %s1089_s1 }
   0x2   :  { %12 = vsyncpa [#allocation3], 0 }
   0x3   :  { %14 = vsyncpa [#allocation3 + $0x1], 0 }
   0x4   :  { %15 = vsyncpa [#allocation6], 0 }
   0x5   :  { %16 = vsyncpa [#allocation9], 0 }
   0x6   :  { %17 = vsyncpa [#allocation4], 0 }
   0x7   :  { %19 = vsyncpa [#allocation4 + $0x1], 0  ;;  %s919_s24 = smov 0   ;;  %s921_s25 = smov 0  }
   0x8   :  { %s923_s26 = smov 0   ;;  %s925_s27 = smov 0  }
   0x9 LB: > { %s1097_s1 = sld [smem:[#allocation15_spill]]  ;;  %s943_s8 = sadd.s32 4294967295, %s872_s27   ;;  %s872_s27 = sphi %s925_s27, %s1108_s27   ;;  %s868_s26 = sphi %s923_s26, %s1107_s26   ;;  %s864_s25 = sphi %s921_s25, %s1106_s25   ;;  %s860_s24 = sphi %s919_s24, %s1105_s24  }
   0xa   : > { %p578_p0 = scmp.ge.s32.totalorder %s872_s27, 1  ;;  %p46_p1 = scmp.eq.s32.totalorder %s943_s8, 0 }
   0xb   : > { %p208_p2 = scmp.lt.s32.totalorder %s872_s27, 3  ;;  %s874_s10 = smov [#allocation5]  }
   0xc   : > { %s221_s11 = sshll.u32 %s874_s10, 4  ;;  %s236_s14 = sshll.u32 %s1091_s3, 4  ;;  %s222_s11 = int_to_ptr.vmem [resolvable:$true] %s221_s11  ;;  %s237_s14 = int_to_ptr.hbm [resolvable:$true] %s236_s14 }
   0xd   : > { %p948_p3 = pnand %p578_p0, %p208_p2  ;;  %s253_s18 = sshll.u32 %s1093_s5, 4  ;;  %s254_s18 = int_to_ptr.hbm [resolvable:$true] %s253_s18 }
   0xe   : > { %s875_s19 = smov [#allocation7]   ;;  %s876_s21 = smov 128  }
   0xf   : > { %s219_s30 = sshll.u32 %s1097_s1, 4  ;;  %p612_p4 = pneg %p948_p3  ;;  %s220_s30 = int_to_ptr.hbm [resolvable:$true] %s219_s30 }
  0x10   : > { %s238_s20 = sshll.u32 %s875_s19, 4  ;;  %s877_s22 = smov 8   ;;  %s239_s20 = int_to_ptr.vmem [resolvable:$true] %s238_s20 }
  0x11   : > { %p960_p6 = pnand %p612_p4, %p46_p1  ;;  %s878_s23 = smov [#allocation8]  }
  0x12   : > { %s255_s28 = sshll.u32 %s878_s23, 4  ;;  %s577_s29 = sadd.s32 4294967294, %s872_s27   ;;  %s256_s28 = int_to_ptr.vmem [resolvable:$true] %s255_s28 }
  0x13   : > { %615 = dma.hbm_to_vmem [thread:$0]  (!%p960_p6), %s220_s30, 512, %s222_s11, [#allocation6], %s876_s21, %s876_s21, %s877_s22  }
  0x14   : > { %618 = dma.hbm_to_vmem [thread:$0]  (!%p960_p6), %s237_s14, 2048, %s239_s20, [#allocation6], %s876_s21, %s876_s21, %s877_s22  }
  0x15   : > { %621 = dma.hbm_to_vmem [thread:$0]  (!%p960_p6), %s254_s18, 2048, %s256_s28, [#allocation9], %s876_s21, %s876_s21, %s877_s22  }
  0x16   : > { %s975_s10 = sadd.s32 1, %s872_s27   ;;  %s32_s12 = sadd.s32 1, %s868_s26 }
  0x17   : > { %s29_s30 = ssub.s32 %s872_s27, %s975_s10  ;;  %p39_p7 = scmp.ne.s32.totalorder %s868_s26, %s864_s25 }
  0x18   : > { %p30_p8 = scmp.eq.s32.totalorder %s29_s30, 0  ;;  %p40_p9 = scmp.eq.s32.totalorder %s872_s27, 0 }
  0x19   : > { %p45_p10 = scmp.ne.s32.totalorder %s864_s25, %s860_s24  ;;  %p195_p11 = scmp.eq.s32.totalorder %s943_s8, 1 }
  0x1a   : > { %s987_s11 = scalar_select %p30_p8, %s868_s26, %s32_s12  }
  0x1b   : > { %p991_p12 = por %p46_p1, %p45_p10  ;;  %p995_p13 = por %p195_p11, %p39_p7 }
  0x1c   : > { %p201_p0 = scmp.eq.s32.totalorder %s577_s29, 1  ;;  %p41_p2 = por %p40_p9, %p39_p7 }
  0x1d   : > { %s272_s15 = sand.u32 1, %s868_s26   ;;  %p633_p6 = scmp.lt.s32.totalorder %s872_s27, 2 }
  0x1e   : > { %p1000_p4 = por %p201_p0, %p45_p10  ;;  %s583_s17 = sshll.u32 %s272_s15, 3 }
  0x1f   : > { %s584_s18 = sshll.u32 %s872_s27, 3  ;;  %s276_s23 = scalar_lea.vmem [#allocation2], %s583_s17 }
  0x20   : > { %s280_s21 = scalar_lea.hbm %s1088_s0, %s584_s18  ;;  %s284_s28 = sshll.u32 %s276_s23, 4  ;;  %s285_s28 = int_to_ptr.vmem [resolvable:$true] %s284_s28 }
  0x21   : > { %s282_s22 = sshll.u32 %s280_s21, 4  ;;  %p1009_p8 = pnand %p633_p6, %p41_p2  ;;  %s283_s22 = int_to_ptr.hbm [resolvable:$true] %s282_s22 }
  0x22   : > { %s273_s12 = scalar_lea.sflag [#allocation3], %s272_s15  ;;  %s768_s30 = sshra.s32 %s283_s22, 4  ;;  %s769_s30 = int_to_ptr.hbm [resolvable:$true] %s768_s30 }
  0x23   : > { %s770_s1 = scalar_lea.hbm %s769_s30, 8  ;;  %p772_p9 = pneg %p1009_p8 }
  0x24   : > { %p771_p7 = scmp.ne.s32.totalorder %s769_s30, %s770_s1  ;;  %s775_s17 = scalar_lea.hbm %s1088_s0, 16 }
  0x25   : > { %p776_p0 = scmp.lt.s32.totalorder %s769_s30, %s1088_s0  ;;  %p777_p2 = scmp.lt.s32.totalorder %s775_s17, %s770_s1 }
  0x26   : > { %p773_p10 = pnand %p772_p9, %p771_p7 }
  0x27   : > { %p778_p6 = por %p777_p2, %p776_p0 }
  0x28   : > { %p774_p11 = pneg %p773_p10 }
  0x2a   : > { %p779_p5 = pnand %p778_p6, %p774_p11 }
  0x2c   : > { %782 = shalt.err (!%p779_p5)
}
  0x2d   : > { %625 = dma.hbm_to_vmem [thread:$0]  (!%p1009_p8), %s283_s22, 128, %s285_s28, %s273_s12  }
  0x2e   : > { %293 = sbr.rel (%p948_p3) target bundleno = 461 (0x1cd), region = 48  ;;  %s1026_s15 = sand.u32 (!%p948_p3), 1, %s864_s25  }
  0x2f   : > { %s586_s23 = sshll.u32 (!%p948_p3), %s1026_s15, 3  ;;  %s296_s18 = scalar_lea.sflag (!%p948_p3), [#allocation3], %s1026_s15 }
  0x30   : > { %s299_s1 = scalar_lea.vmem (!%p948_p3), [#allocation2], %s586_s23 }
  0x33   : > { %843 = dma.done.wait (%p991_p12), %s296_s18, 128  }
  0x34   : > { %845 = vsyncadd (%p991_p12), %s296_s18, 4294967168 }
  0x35   : > { %847 = dma.done.wait (%p46_p1), [#allocation6], 2560  }
  0x36   : > { %849 = vsyncadd (%p46_p1), [#allocation6], 4294964736 }
  0x37   : > { %851 = dma.done.wait (%p46_p1), [#allocation9], 2048  }
  0x38   : > { %853 = vsyncadd (%p46_p1), [#allocation9], 4294965248  ;;  %v350_v0 = vld [vmem:[#allocation5 + $0x18] sm:$0xff]  ;;  %v349_v1 = vld [vmem:[#allocation5 + $0x10] sm:$0xff]  ;;  %vm355_vm0 = vcmask 261120   ;;  %s593_s29 = sshll.u32 %s943_s8, 3 }
  0x39   : > { %371 = vmatpush.msra.mxu0 %v350_v0  ;;  %v395_v2 = vld [vmem:[#allocation7 + $0x78] sm:$0xff]  ;;  %v348_v3 = vld [vmem:[#allocation5 + $0x8] sm:$0xff]  ;;  %v394_v4 = vld [vmem:[#allocation7 + $0x70] sm:$0xff]  ;;  %s473_s19 = scalar_lea.hbm %s1095_s7, %s593_s29  ;;  %s345_s21 = scalar_lea.vmem [#allocation10], %s586_s23 }
  0x3a   : > { %400 = vmatpush.msra.mxu1 %v395_v2  ;;  %v393_v5 = vld [vmem:[#allocation7 + $0x68] sm:$0xff]  ;;  %v347_v6 = vld [vmem:[#allocation5] sm:$0xff]  ;;  %v346_v7 = vld [vmem:[%s299_s1] sm:$0xff]  ;;  %s475_s18 = sshll.u32 %s345_s21, 4  ;;  %s477_s1 = sshll.u32 %s473_s19, 4  ;;  %s476_s18 = int_to_ptr.vmem [resolvable:$true] %s475_s18  ;;  %s478_s1 = int_to_ptr.hbm [resolvable:$true] %s477_s1 }
  0x3b   : > { %372 = vmatpush.msra.mxu0 %v349_v1  ;;  %v392_v8 = vld [vmem:[#allocation7 + $0x60] sm:$0xff]  ;;  %v391_v9 = vld [vmem:[#allocation7 + $0x58] sm:$0xff]  ;;  %v390_v10 = vld [vmem:[#allocation7 + $0x50] sm:$0xff]  ;;  %s463_s9 = scalar_lea.sflag [#allocation4], %s1026_s15  ;;  %s812_s8 = sshra.s32 %s478_s1, 4  ;;  %s813_s8 = int_to_ptr.hbm [resolvable:$true] %s812_s8 }
  0x3c   : > { %401 = vmatpush.msra.mxu1 %v394_v4  ;;  %v389_v11 = vld [vmem:[#allocation7 + $0x48] sm:$0xff]  ;;  %v388_v12 = vld [vmem:[#allocation7 + $0x40] sm:$0xff]  ;;  %v387_v13 = vld [vmem:[#allocation7 + $0x38] sm:$0xff]  ;;  %s814_s13 = scalar_lea.hbm %s813_s8, 8  ;;  %s818_s29 = scalar_lea.hbm %s1095_s7, 16 }
  0x3d   : > { %373 = vmatpush.msra.mxu0 %v348_v3  ;;  %v386_v14 = vld [vmem:[#allocation7 + $0x30] sm:$0xff]  ;;  %v385_v15 = vld [vmem:[#allocation7 + $0x28] sm:$0xff]  ;;  %v384_v16 = vld [vmem:[#allocation7 + $0x20] sm:$0xff]  ;;  %p815_p1 = scmp.ne.s32.totalorder %s813_s8, %s814_s13  ;;  %p819_p12 = scmp.lt.s32.totalorder %s813_s8, %s1095_s7 }
  0x3e   : > { %402 = vmatpush.msra.mxu1 %v393_v5  ;;  %v383_v17 = vld [vmem:[#allocation7 + $0x18] sm:$0xff]  ;;  %v382_v18 = vld [vmem:[#allocation7 + $0x10] sm:$0xff]  ;;  %v381_v19 = vld [vmem:[#allocation7 + $0x8] sm:$0xff]  ;;  %p820_p8 = scmp.lt.s32.totalorder %s818_s29, %s814_s13 }
  0x3f   : > { %374 = vmatpush.msra.mxu0 %v347_v6  ;;  %v380_v20 = vld [vmem:[#allocation7] sm:$0xff]  ;;  %v436_v21 = vld [vmem:[#allocation8 + $0x78] sm:$0xff]  ;;  %v435_v22 = vld [vmem:[#allocation8 + $0x70] sm:$0xff]  ;;  %p816_p3 = pnand %p815_p1, %p995_p13 }
  0x40   : > { %591 = vmatmul.msk.f32.vlgmr.msra.gmra.mxu0 %vm355_vm0, %v346_v7  ;;  %403 = vmatpush.msra.mxu1 %v392_v8  ;;  %v434_v23 = vld [vmem:[#allocation8 + $0x68] sm:$0xff]  ;;  %v433_v24 = vld [vmem:[#allocation8 + $0x60] sm:$0xff]  ;;  %v432_v25 = vld [vmem:[#allocation8 + $0x58] sm:$0xff]  ;;  %p821_p7 = por %p820_p8, %p819_p12 }
  0x41   : > { %441 = vmatpush.msra.mxu2 %v436_v21  ;;  %v431_v26 = vld [vmem:[#allocation8 + $0x50] sm:$0xff]  ;;  %v430_v27 = vld [vmem:[#allocation8 + $0x48] sm:$0xff]  ;;  %v429_v28 = vld [vmem:[#allocation8 + $0x40] sm:$0xff]  ;;  %p817_p5 = pneg %p816_p3 }
  0x42   : > { %404 = vmatpush.msra.mxu1 %v391_v9  ;;  %v428_v29 = vld [vmem:[#allocation8 + $0x38] sm:$0xff]  ;;  %v427_v30 = vld [vmem:[#allocation8 + $0x30] sm:$0xff]  ;;  %v426_v31 = vld [vmem:[#allocation8 + $0x28] sm:$0xff] }
  0x43   : > { %442 = vmatpush.msra.mxu2 %v435_v22  ;;  %v425_v32 = vld [vmem:[#allocation8 + $0x20] sm:$0xff]  ;;  %v424_v33 = vld [vmem:[#allocation8 + $0x18] sm:$0xff]  ;;  %v675_v34 = vld [vmem:[%s1090_s2] ss:$0 sm:$0xff]  ;;  %p822_p9 = pnand %p821_p7, %p817_p5 }
  0x44   : > { %405 = vmatpush.msra.mxu1 %v390_v10  ;;  %v423_v38 = vld [vmem:[#allocation8 + $0x10] sm:$0xff]  ;;  %v422_v39 = vld [vmem:[#allocation8 + $0x8] sm:$0xff]  ;;  %v421_v40 = vld [vmem:[#allocation8] sm:$0xff] }
  0x45   : > { %443 = vmatpush.msra.mxu2 %v434_v23  ;;  %v676_v41 = vld [vmem:[%s1092_s4] ss:$0 sm:$0xff] }
  0x46   : > { %406 = vmatpush.msra.mxu1 %v389_v11  ;;  %v677_v45 = vld [vmem:[%s1094_s6] ss:$0 sm:$0xff] }
  0x47   : > { %444 = vmatpush.msra.mxu2 %v433_v24 }
  0x48   : > { %407 = vmatpush.msra.mxu1 %v388_v12 }
  0x49   : > { %445 = vmatpush.msra.mxu2 %v432_v25 }
  0x4a   : > { %408 = vmatpush.msra.mxu1 %v387_v13 }
  0x4b   : > { %446 = vmatpush.msra.mxu2 %v431_v26 }
  0x4c   : > { %409 = vmatpush.msra.mxu1 %v386_v14 }
  0x4d   : > { %447 = vmatpush.msra.mxu2 %v430_v27 }
  0x4e   : > { %410 = vmatpush.msra.mxu1 %v385_v15 }
  0x4f   : > { %448 = vmatpush.msra.mxu2 %v429_v28 }
  0x50   : > { %411 = vmatpush.msra.mxu1 %v384_v16 }
  0x51   : > { %449 = vmatpush.msra.mxu2 %v428_v29 }
  0x52   : > { %412 = vmatpush.msra.mxu1 %v383_v17 }
  0x53   : > { %450 = vmatpush.msra.mxu2 %v427_v30 }
  0x54   : > { %413 = vmatpush.msra.mxu1 %v382_v18 }
  0x55   : > { %451 = vmatpush.msra.mxu2 %v426_v31 }
  0x56   : > { %414 = vmatpush.msra.mxu1 %v381_v19 }
  0x57   : > { %452 = vmatpush.msra.mxu2 %v425_v32 }
  0x58   : > { %415 = vmatpush.msra.mxu1 %v380_v20 }
  0x59   : > { %453 = vmatpush.msra.mxu2 %v424_v33 }
  0x5b   : > { %454 = vmatpush.msra.mxu2 %v423_v38 }
  0x5d   : > { %455 = vmatpush.msra.mxu2 %v422_v39 }
  0x5f   : > { %456 = vmatpush.msra.mxu2 %v421_v40 }
  0xbd   : > { %v376_v35 = vpop.f32.mrf.mxu0 }
  0xbe   : > { %v377_v36 = vadd.f32 %v675_v34, %v376_v35 }
  0xc0   : > { %v379_v37 = vmax.f32 %v377_v36, 0.0 }
  0xc2   : > { %416 = vmatmul.f32.vlgmr.msra.gmra.mxu1 %v379_v37 }
 0x13f   : > { %v417_v42 = vpop.f32.mrf.mxu1 }
 0x140   : > { %v418_v43 = vadd.f32 %v676_v41, %v417_v42 }
 0x142   : > { %v420_v44 = vmax.f32 %v418_v43, 0.0 }
 0x144   : > { %457 = vmatmul.f32.vlgmr.msra.gmra.mxu2 %v420_v44 }
 0x1c7   : > { %v458_v46 = vpop.f32.mrf.mxu2 }
 0x1c8   : > { %v459_v47 = vadd.f32 %v677_v45, %v458_v46 }
 0x1ca   : > { %461 = vst [vmem:[%s345_s21] sm:$0xff] %v459_v47 }
 0x1cb   : > { %825 = shalt.err (!%p822_p9)
}
 0x1cc   : > { %610 = dma.vmem_to_hbm [thread:$0]  (%p995_p13), %s476_s18, 128, %s478_s1, %s463_s9  }
 0x1cd PF: > { %s489_s15 = sand.u32 1, %s860_s24   ;;  %p1104_p10 = scmp.ge.s32.totalorder %s872_s27, 2 }
 0x1ce   : > { %s490_s30 = scalar_lea.sflag [#allocation4], %s489_s15 }
 0x1cf   : > { %p627_p11 = pnand %p1104_p10, %p1000_p4 }
 0x1d1   : > { %p628_p0 = pneg %p627_p11 }
 0x1d3   : > { %855 = dma.done.wait (%p628_p0), %s490_s30, 128  }
 0x1d4   : > { %857 = vsyncadd (%p628_p0), %s490_s30, 4294967168  ;;  %p22_p2 = scmp.ge.s32.totalorder %s975_s10, 4   ;;  %s1105_s24 = smov %s864_s25 }
 0x1d5   : > { %s1106_s25 = smov %s868_s26  ;;  %s1107_s26 = smov %s987_s11 }
 0x1d6   : > { %s1108_s27 = smov %s975_s10  ;;  %24 = sbr.rel (!%p22_p2) target bundleno = 9 (0x9), region = 105 }
 0x1db   :  { %496 = vsyncpa [#allocation3], 1 }
 0x1dc   :  { %498 = vsyncpa [#allocation3 + $0x1], 1 }
 0x1dd   :  { %499 = vsyncpa [#allocation6], 1 }
 0x1de   :  { %500 = vsyncpa [#allocation9], 1 }
 0x1df   :  { %501 = vsyncpa [#allocation4], 1 }
 0x1e0   :  { %503 = vsyncpa [#allocation4 + $0x1], 1 }

</bundles_post_ra>
